<compile_context>
chip_gen: v7x
topology: tpu7x:2x2x1
jax: 0.10.0
libtpu: 0.0.40
codegen_flags: <defaults>
</compile_context>

<pallas_src>
import functools
import math

import jax
import jax.numpy as jnp
from jax.experimental import pallas as pl
from jax.experimental.pallas import tpu as pltpu


def _fir_kernel(x_ref, w_ref, h_ref, o_ref, *, C, TL):
    """x_ref: (TR, TL) chunk rows; w_ref: (3, TL) f32 per-lane taps;
    h_ref: (TR, 2C) = [left halo | right halo]; o_ref: (TR, TL)."""
    x = x_ref[...]
    w0 = w_ref[0:1, :]
    w1 = w_ref[1:2, :]
    w2 = w_ref[2:3, :]

    # Bulk of the tile via cyclic lane rolls (XLU); the first/last C lanes
    # come out wrong and are fixed up with two tiny masked stores below.
    x_prev = pltpu.roll(x, shift=C, axis=1)        # x[f-C]  (valid for f >= C)
    x_next = pltpu.roll(x, shift=TL - C, axis=1)   # x[f+C]  (valid for f < TL-C)
    o_ref[...] = (w0 * x_prev + w1 * x + w2 * x_next).astype(o_ref.dtype)

    # Left edge: lanes [0, C) take x[f-C] from the left halo.
    left = h_ref[:, 0:C]
    o_ref[:, 0:C] = (w0[:, 0:C] * left
                     + w1[:, 0:C] * x_ref[:, 0:C]
                     + w2[:, 0:C] * x_ref[:, C:2 * C]).astype(o_ref.dtype)

    # Right edge: lanes [TL-C, TL) take x[f+C] from the right halo.
    right = h_ref[:, C:2 * C]
    o_ref[:, TL - C:TL] = (w0[:, TL - C:] * x_ref[:, TL - 2 * C:TL - C]
                           + w1[:, TL - C:] * x_ref[:, TL - C:]
                           + w2[:, TL - C:] * right).astype(o_ref.dtype)


def _round_up(x, m):
    return ((x + m - 1) // m) * m


def _device_kind():
    try:
        return jax.devices()[0].device_kind.lower()
    except Exception:
        return ""


def _pick_lane_tile(P, unit, min_tl, cap):
    """Lane tile TL (multiple of `unit`, >= min_tl) and padded per-batch
    length P_pad (a multiple of TL).  Prefers an exact divisor of P (no pad)."""
    cap = max(cap, min_tl)
    if P <= cap:
        tl = max(_round_up(P, unit), min_tl)
        return tl, _round_up(P, tl)
    d = (cap // unit) * unit
    while d >= min_tl:
        if P % d == 0:
            return d, P
        d -= unit
    tl = (cap // unit) * unit
    return tl, _round_up(P, tl)


def _largest_row_tile(n, cap):
    """Largest multiple of 8 that divides n and is <= cap (requires 8 | n)."""
    d = (min(cap, n) // 8) * 8
    while d > 8:
        if n % d == 0:
            return d
        d -= 8
    return 8


def signal_filter_pallas(x, weight, *, lane_cap=8192):
    """x: (B, L, C).  weight: (C, 1, 3) torch depthwise taps.
    Returns (B, L, C), matching F.conv1d(groups=C, stride=1, padding=1)."""
    B, L, C = x.shape
    dtype = x.dtype
    itemsize = jnp.dtype(dtype).itemsize

    # ---- generation-aware tile / VMEM budget --------------------------------
    kind = _device_kind()
    is_v7 = ("v7" in kind) or ("7x" in kind) or (kind == "")   # unknown -> conservative
    per_buf_bytes = (4 if is_v7 else 8) * 1024 * 1024
    vmem_limit = (48 if is_v7 else 80) * 1024 * 1024

    # ---- lane tiling of the flat (row-major) signal --------------------------
    P = L * C                                    # per-batch flat length
    unit = (128 * C) // math.gcd(128, C)         # chunk starts stay channel-aligned
    min_tl = _round_up(2 * C, unit)              # edge fix-up needs TL >= 2C
    TL, P_pad = _pick_lane_tile(P, unit, min_tl, lane_cap)
    Lp = P_pad // C
    if Lp != L:                                  # rare: pad along L (zero pad == conv pad)
        x = jnp.pad(x, ((0, 0), (0, Lp - L), (0, 0)))

    Q = P_pad // TL                              # chunks per batch
    NT = B * Q                                   # total chunks (= rows of 2-D view)

    # ---- row (sublane) tiling -------------------------------------------------
    row_cap = max(8, min(per_buf_bytes // (TL * itemsize), 4096))
    if NT >= 16:
        row_cap = min(row_cap, max(8, NT // 2))  # >=2 grid steps -> both v7x TCs busy
    if NT % 8 == 0:
        TR, NT_pad = _largest_row_tile(NT, row_cap), NT
    elif NT <= 8 or NT * TL * itemsize <= 2 * per_buf_bytes:
        TR, NT_pad = NT, NT                      # full-dim row block (always legal)
    else:
        TR = max(8, (row_cap // 8) * 8)
        NT_pad = _round_up(NT, TR)               # rare: pad trailing chunks
    NR = NT_pad // TR

    # ---- 2-D chunk view + tiny side inputs (no full-array pad on fast path) --
    x_flat = x.reshape(B * P_pad)
    if NT_pad != NT:
        x_flat = jnp.concatenate([x_flat, jnp.zeros(((NT_pad - NT) * TL,), dtype)])
    x2d = x_flat.reshape(NT_pad, TL)

    # Per-lane taps, f32 (accumulate in f32, cast at the store).
    w_lanes = jnp.tile(weight[:, 0, :].astype(jnp.float32).T, (1, TL // C))  # (3, TL)

    # Per-chunk halos: left = last C lanes of previous chunk, right = first C
    # lanes of next chunk, zeroed at batch boundaries (conv zero padding).
    heads = x2d[:, 0:C]                           # (NT_pad, C)  tiny strided slices
    tails = x2d[:, TL - C:TL]                     # (NT_pad, C)
    zrow = jnp.zeros((1, C), dtype)
    idx = jnp.arange(NT_pad)
    left = jnp.where((idx % Q == 0)[:, None], 0.0,
                     jnp.concatenate([zrow, tails[:-1]], axis=0))
    right = jnp.where((idx % Q == Q - 1)[:, None], 0.0,
                      jnp.concatenate([heads[1:], zrow], axis=0))
    halos = jnp.concatenate([left, right], axis=1).astype(dtype)   # (NT_pad, 2C)

    kernel = functools.partial(_fir_kernel, C=C, TL=TL)
    out2d = pl.pallas_call(
        kernel,
        out_shape=jax.ShapeDtypeStruct((NT_pad, TL), dtype),
        grid_spec=pltpu.PrefetchScalarGridSpec(
            num_scalar_prefetch=0,
            grid=(NR,),
            in_specs=[
                pl.BlockSpec((TR, TL), lambda r: (r, 0)),      # x chunks
                pl.BlockSpec((3, TL), lambda r: (0, 0)),       # taps (VMEM resident)
                pl.BlockSpec((TR, 2 * C), lambda r: (r, 0)),   # merged halos
            ],
            out_specs=pl.BlockSpec((TR, TL), lambda r: (r, 0)),
        ),
        compiler_params=pltpu.CompilerParams(
            dimension_semantics=("parallel",),
            vmem_limit_bytes=vmem_limit,
        ),
    )(x2d, w_lanes, halos)

    out = out2d.reshape(-1)[:B * P_pad].reshape(B, Lp, C)
    return out[:, :L, :] if Lp != L else out


def _reference(x, weight):
    """Pure-JAX reference matching F.conv1d(groups=C, padding=1, stride=1)."""
    B, L, C = x.shape
    w = jnp.transpose(weight[:, 0, :], (1, 0)).astype(jnp.float32)   # (3, C)
    xp = jnp.pad(x.astype(jnp.float32), ((0, 0), (1, 1), (0, 0)))
    y = (w[0][None, None, :] * xp[:, 0:L, :]
         + w[1][None, None, :] * xp[:, 1:L + 1, :]
         + w[2][None, None, :] * xp[:, 2:L + 2, :])
    return y.astype(x.dtype)


if __name__ == "__main__":
    key = jax.random.PRNGKey(0)
    k0, k1, k2, k3 = jax.random.split(key, 4)

    # --- test 1: module-sized shapes, kernel_op='order1_MA' ------------------
    B, L, C = 2, 16, 4
    x = jax.random.normal(k0, (B, L, C), dtype=jnp.float32)
    taps = jnp.array([0.5, 0.0, 0.5], dtype=jnp.float32)        # 'order1_MA'
    weight = jnp.tile(taps.reshape(1, 1, 3), (C, 1, 1))         # (C, 1, 3)
    out = jax.block_until_ready(signal_filter_pallas(x, weight))
    assert out.shape == (B, L, C)
    assert jnp.allclose(out, _reference(x, weight), atol=1e-5, rtol=1e-5)

    # --- test 2: multi-chunk grid (TL=128, 32 chunks, 2 grid steps, halos) ---
    B2, L2, C2 = 2, 512, 4
    x2 = jax.random.normal(k1, (B2, L2, C2), dtype=jnp.float32)
    w2 = jax.random.normal(k2, (C2, 1, 3), dtype=jnp.float32)
    out2 = jax.block_until_ready(signal_filter_pallas(x2, w2, lane_cap=128))
    assert jnp.allclose(out2, _reference(x2, w2), atol=1e-5, rtol=1e-5)

    # --- test 3: non-divisible L exercises the L-padding fallback ------------
    B3, L3, C3 = 3, 37, 4
    x3 = jax.random.normal(k3, (B3, L3, C3), dtype=jnp.float32)
    w3 = jnp.tile(jnp.array([-1.0, 2.0, -1.0], jnp.float32).reshape(1, 1, 3),
                  (C3, 1, 1))                                   # 'order2_DF'
    out3 = jax.block_until_ready(signal_filter_pallas(x3, w3))
    assert jnp.allclose(out3, _reference(x3, w3), atol=1e-5, rtol=1e-5)

    print("KERNEL_OK")
</pallas_src>

<mosaic_0001>
module attributes {stable_mosaic.version = 11 : i64} {
  func.func @_fir_kernel(%arg0: i32, %arg1: memref<2x128xf32, #tpu.memory_space<vmem>>, %arg2: memref<3x128xf32, #tpu.memory_space<vmem>>, %arg3: memref<2x8xf32, #tpu.memory_space<vmem>>, %arg4: memref<2x128xf32, #tpu.memory_space<vmem>>) attributes {dimension_semantics = [#tpu.dimension_semantics<parallel>], iteration_bounds = array<i64: 1>, scalar_prefetch = 0 : i64, scratch_operands = 0 : i64, tpu.core_type = #tpu.core_type<tc>, window_params = [{transform_indices = @transform_0, window_bounds = array<i64: 2, 128>}, {pipeline_mode = #tpu.pipeline_mode<synchronous>, transform_indices = @transform_1, window_bounds = array<i64: 3, 128>}, {transform_indices = @transform_2, window_bounds = array<i64: 2, 8>}, {transform_indices = @transform_3, window_bounds = array<i64: 2, 128>}]} {
    %c0 = arith.constant 0 : index
    %c0_0 = arith.constant 0 : index
    %0 = vector.load %arg1[%c0, %c0_0] : memref<2x128xf32, #tpu.memory_space<vmem>>, vector<2x128xf32>
    %c0_1 = arith.constant 0 : index
    %c0_2 = arith.constant 0 : index
    %1 = vector.load %arg2[%c0_1, %c0_2] : memref<3x128xf32, #tpu.memory_space<vmem>>, vector<1x128xf32>
    %c1 = arith.constant 1 : index
    %c0_3 = arith.constant 0 : index
    %2 = vector.load %arg2[%c1, %c0_3] : memref<3x128xf32, #tpu.memory_space<vmem>>, vector<1x128xf32>
    %c2 = arith.constant 2 : index
    %c0_4 = arith.constant 0 : index
    %3 = vector.load %arg2[%c2, %c0_4] : memref<3x128xf32, #tpu.memory_space<vmem>>, vector<1x128xf32>
    %c4_i32 = arith.constant 4 : i32
    %4 = tpu.dynamic_rotate %0 by %c4_i32 dim 1 : vector<2x128xf32>, i32 -> vector<2x128xf32>
    %c124_i32 = arith.constant 124 : i32
    %5 = tpu.dynamic_rotate %0 by %c124_i32 dim 1 : vector<2x128xf32>, i32 -> vector<2x128xf32>
    %6 = vector.broadcast %1 : vector<1x128xf32> to vector<2x128xf32>
    %7 = arith.mulf %6, %4 : vector<2x128xf32>
    %8 = vector.broadcast %2 : vector<1x128xf32> to vector<2x128xf32>
    %9 = arith.mulf %8, %0 : vector<2x128xf32>
    %10 = arith.addf %7, %9 : vector<2x128xf32>
    %11 = vector.broadcast %3 : vector<1x128xf32> to vector<2x128xf32>
    %12 = arith.mulf %11, %5 : vector<2x128xf32>
    %13 = arith.addf %10, %12 : vector<2x128xf32>
    %c0_5 = arith.constant 0 : index
    %c0_6 = arith.constant 0 : index
    %14 = vector.load %arg4[%c0_5, %c0_6] : memref<2x128xf32, #tpu.memory_space<vmem>>, vector<2x128xf32>
    tpu.vector_store %arg4[%c0_5, %c0_6], %13 {strides = array<i32>} : memref<2x128xf32, #tpu.memory_space<vmem>>, vector<2x128xf32>,
    %c0_7 = arith.constant 0 : index
    %c0_8 = arith.constant 0 : index
    %15 = vector.load %arg3[%c0_7, %c0_8] : memref<2x8xf32, #tpu.memory_space<vmem>>, vector<2x4xf32>
    %16 = vector.extract_strided_slice %1 {offsets = [0, 0], sizes = [1, 4], strides = [1, 1]} : vector<1x128xf32> to vector<1x4xf32>
    %17 = vector.broadcast %16 : vector<1x4xf32> to vector<2x4xf32>
    %18 = arith.mulf %17, %15 : vector<2x4xf32>
    %19 = vector.extract_strided_slice %2 {offsets = [0, 0], sizes = [1, 4], strides = [1, 1]} : vector<1x128xf32> to vector<1x4xf32>
    %c0_9 = arith.constant 0 : index
    %c0_10 = arith.constant 0 : index
    %20 = vector.load %arg1[%c0_9, %c0_10] : memref<2x128xf32, #tpu.memory_space<vmem>>, vector<2x4xf32>
    %21 = vector.broadcast %19 : vector<1x4xf32> to vector<2x4xf32>
    %22 = arith.mulf %21, %20 : vector<2x4xf32>
    %23 = arith.addf %18, %22 : vector<2x4xf32>
    %24 = vector.extract_strided_slice %3 {offsets = [0, 0], sizes = [1, 4], strides = [1, 1]} : vector<1x128xf32> to vector<1x4xf32>
    %c0_11 = arith.constant 0 : index
    %c4 = arith.constant 4 : index
    %25 = vector.load %arg1[%c0_11, %c4] : memref<2x128xf32, #tpu.memory_space<vmem>>, vector<2x4xf32>
    %26 = vector.broadcast %24 : vector<1x4xf32> to vector<2x4xf32>
    %27 = arith.mulf %26, %25 : vector<2x4xf32>
    %28 = arith.addf %23, %27 : vector<2x4xf32>
    %c0_12 = arith.constant 0 : index
    %c0_13 = arith.constant 0 : index
    %29 = vector.load %arg4[%c0_12, %c0_13] : memref<2x128xf32, #tpu.memory_space<vmem>>, vector<2x4xf32>
    tpu.vector_store %arg4[%c0_12, %c0_13], %28 {strides = array<i32>} : memref<2x128xf32, #tpu.memory_space<vmem>>, vector<2x4xf32>,
    %c0_14 = arith.constant 0 : index
    %c4_15 = arith.constant 4 : index
    %30 = vector.load %arg3[%c0_14, %c4_15] : memref<2x8xf32, #tpu.memory_space<vmem>>, vector<2x4xf32>
    %31 = vector.extract_strided_slice %1 {offsets = [0, 124], sizes = [1, 4], strides = [1, 1]} : vector<1x128xf32> to vector<1x4xf32>
    %c0_16 = arith.constant 0 : index
    %c120 = arith.constant 120 : index
    %32 = vector.load %arg1[%c0_16, %c120] : memref<2x128xf32, #tpu.memory_space<vmem>>, vector<2x4xf32>
    %33 = vector.broadcast %31 : vector<1x4xf32> to vector<2x4xf32>
    %34 = arith.mulf %33, %32 : vector<2x4xf32>
    %35 = vector.extract_strided_slice %2 {offsets = [0, 124], sizes = [1, 4], strides = [1, 1]} : vector<1x128xf32> to vector<1x4xf32>
    %c0_17 = arith.constant 0 : index
    %c124 = arith.constant 124 : index
    %36 = vector.load %arg1[%c0_17, %c124] : memref<2x128xf32, #tpu.memory_space<vmem>>, vector<2x4xf32>
    %37 = vector.broadcast %35 : vector<1x4xf32> to vector<2x4xf32>
    %38 = arith.mulf %37, %36 : vector<2x4xf32>
    %39 = arith.addf %34, %38 : vector<2x4xf32>
    %40 = vector.extract_strided_slice %3 {offsets = [0, 124], sizes = [1, 4], strides = [1, 1]} : vector<1x128xf32> to vector<1x4xf32>
    %41 = vector.broadcast %40 : vector<1x4xf32> to vector<2x4xf32>
    %42 = arith.mulf %41, %30 : vector<2x4xf32>
    %43 = arith.addf %39, %42 : vector<2x4xf32>
    %c0_18 = arith.constant 0 : index
    %c124_19 = arith.constant 124 : index
    %44 = vector.load %arg4[%c0_18, %c124_19] : memref<2x128xf32, #tpu.memory_space<vmem>>, vector<2x4xf32>
    tpu.vector_store %arg4[%c0_18, %c124_19], %43 {strides = array<i32>} : memref<2x128xf32, #tpu.memory_space<vmem>>, vector<2x4xf32>,
    return
  }
  func.func @transform_0(%arg0: i32) -> (i32, i32) {
    %c0_i32 = arith.constant 0 : i32
    %c0_i32_0 = arith.constant 0 : i32
    return %arg0, %c0_i32 : i32, i32
  }
  func.func @transform_1(%arg0: i32) -> (i32, i32) {
    %c0_i32 = arith.constant 0 : i32
    %c0_i32_0 = arith.constant 0 : i32
    %c0_i32_1 = arith.constant 0 : i32
    return %c0_i32, %c0_i32_0 : i32, i32
  }
  func.func @transform_2(%arg0: i32) -> (i32, i32) {
    %c0_i32 = arith.constant 0 : i32
    %c0_i32_0 = arith.constant 0 : i32
    return %arg0, %c0_i32 : i32, i32
  }
  func.func @transform_3(%arg0: i32) -> (i32, i32) {
    %c0_i32 = arith.constant 0 : i32
    %c0_i32_0 = arith.constant 0 : i32
    return %arg0, %c0_i32 : i32, i32
  }
}

</mosaic_0001>

<bundles_post_ra>
// kernel: tpu_custom_call.1
= control target key start
LH: loop header
LB: loop body
LE: loop exit
PB: predicated region body
PF: predicated region fallthrough
CT: control target
= control target key end

     0   :  { %8 = vsyncpa [#allocation3], 0  ;;  %s301_s0 = inlined_call_operand.hbm [shape: f32[2,128], index: 0, kind: input, shape index: {}]   ;;  %s302_s1 = inlined_call_operand.hbm [shape: f32[3,128], index: 1, kind: input, shape index: {}]   ;;  %s303_s2 = inlined_call_operand.hbm [shape: f32[2,8], index: 2, kind: input, shape index: {}]   ;;  %s304_s3 = inlined_call_operand.hbm [shape: f32[2,128], index: 3, kind: output, shape index: {}]  }
   0x1   :  { %9 = vsyncpa [#allocation6], 0 }
   0x2   :  { %10 = vsyncpa [#allocation4], 0  ;;  %s226_s12 = smov [#allocation5]   ;;  %s227_s14 = smov [#allocation2]  }
   0x3   :  { %s27_s13 = sshll.u32 %s226_s12, 4  ;;  %s17_s15 = sshll.u32 %s227_s14, 4  ;;  %s28_s13 = int_to_ptr.vmem [resolvable:$true] %s27_s13  ;;  %s18_s15 = int_to_ptr.vmem [resolvable:$true] %s17_s15 }
   0x4   :  { %s132_s18 = scalar_lea.hbm %s302_s1, 64 }
   0x5   :  { %p133_p0 = scmp.ne.s32.totalorder %s302_s1, %s132_s18  ;;  %p136_p1 = scmp.lt.u32.totalorder %s132_s18, %s302_s1 }
   0x7   :  { %p138_p2 = pnand %p136_p1, %p133_p0 }
   0x9   :  { %141 = shalt.err (!%p138_p2)
}
   0xa   :  { %s142_s23 = scalar_lea.vmem %s28_s13, 64  ;;  %p147_p4 = scmp.lt.s32.totalorder %s28_s13, %s28_s13 }
   0xb   :  { %p143_p3 = scmp.ne.s32.totalorder %s28_s13, %s142_s23  ;;  %p148_p5 = scmp.lt.s32.totalorder %s142_s23, %s142_s23 }
   0xd   :  { %p149_p6 = por %p148_p5, %p147_p4 }
   0xf   :  { %p150_p7 = pnand %p149_p6, %p143_p3 }
  0x11   :  { %153 = shalt.err (!%p150_p7)
}
  0x12   :  { %30 = dma.hbm_to_vmem [thread:$0]  %s302_s1, 64, %s28_s13, [#allocation6]  }
  0x13   :  { %s154_s28 = scalar_lea.hbm %s301_s0, 32 }
  0x14   :  { %p155_p8 = scmp.ne.s32.totalorder %s301_s0, %s154_s28  ;;  %p158_p9 = scmp.lt.u32.totalorder %s154_s28, %s301_s0 }
  0x16   :  { %p160_p10 = pnand %p158_p9, %p155_p8 }
  0x18   :  { %163 = shalt.err (!%p160_p10)
}
  0x19   :  { %s164_s6 = scalar_lea.vmem %s18_s15, 32  ;;  %p169_p12 = scmp.lt.s32.totalorder %s18_s15, %s18_s15 }
  0x1a   :  { %p165_p11 = scmp.ne.s32.totalorder %s18_s15, %s164_s6  ;;  %p170_p13 = scmp.lt.s32.totalorder %s164_s6, %s164_s6 }
  0x1c   :  { %p171_p0 = por %p170_p13, %p169_p12 }
  0x1e   :  { %p172_p1 = pnand %p171_p0, %p165_p11 }
  0x20   :  { %175 = shalt.err (!%p172_p1)
}
  0x21   :  { %20 = dma.hbm_to_vmem [thread:$0]  %s301_s0, 32, %s18_s15, [#allocation3]  }
  0x22   :  { %s228_s8 = smov [#allocation7]   ;;  %s176_s12 = scalar_lea.hbm %s303_s2, 32 }
  0x23   :  { %s37_s9 = sshll.u32 %s228_s8, 4  ;;  %p177_p2 = scmp.ne.s32.totalorder %s303_s2, %s176_s12  ;;  %s38_s9 = int_to_ptr.vmem [resolvable:$true] %s37_s9 }
  0x24   :  { %p180_p3 = scmp.lt.u32.totalorder %s176_s12, %s303_s2 }
  0x26   :  { %p182_p4 = pnand %p180_p3, %p177_p2 }
  0x28   :  { %185 = shalt.err (!%p182_p4)
}
  0x29   :  { %s186_s18 = scalar_lea.vmem %s38_s9, 32  ;;  %p191_p6 = scmp.lt.s32.totalorder %s38_s9, %s38_s9 }
  0x2a   :  { %p187_p5 = scmp.ne.s32.totalorder %s38_s9, %s186_s18  ;;  %p192_p7 = scmp.lt.s32.totalorder %s186_s18, %s186_s18 }
  0x2c   :  { %p193_p8 = por %p192_p7, %p191_p6 }
  0x2e   :  { %p194_p9 = pnand %p193_p8, %p187_p5 }
  0x30   :  { %197 = shalt.err (!%p194_p9)
}
  0x31   :  { %40 = dma.hbm_to_vmem [thread:$0]  %s303_s2, 32, %s38_s9, [#allocation6]  }
  0x32   :  { %220 = dma.done.wait [#allocation3], 32  }
  0x33   :  { %221 = vsyncadd [#allocation3], 4294967264 }
  0x34   :  { %222 = dma.done.wait [#allocation6], 96  }
  0x35   :  { %223 = vsyncadd [#allocation6], 4294967200  ;;  %v50_v0 = vld [vmem:[#allocation2] sm:$0x3]  ;;  %s229_s19 = smov 4   ;;  %s230_s20 = smov 124  }
  0x36   :  { %v90_v1 = vld [vmem:[#allocation2] sm:$0x3]  ;;  %54 = vrot.lane.b32.xlu0 %v50_v0, %s229_s19  ;;  %v89_v3 = vld [vmem:[#allocation7] sm:$0x3]  ;;  %s231_s21 = smov 120   ;;  %vm87_vm0 = vcmask 25600  }
  0x37   :  { %92 = vrot.lane.b32.xlu1 %v90_v1, %s229_s19  ;;  %v78_v2 = vld [vmem:[#allocation2] sm:$0x3]  ;;  %v76_v4 = vld [vmem:[#allocation7] sm:$0x3]  ;;  %v123_v5 = vld [vmem:[#allocation5 + $0x1] ss:$0 sm:$0xff] }
  0x38   :  { %v122_v6 = vld [vmem:[#allocation5] ss:$0 sm:$0xff]  ;;  %v79_v7 = vmul.f32 %v123_v5, %v78_v2  ;;  %v67_v12 = vmul.f32 %v123_v5, %v50_v0  ;;  %v124_v13 = vld [vmem:[#allocation5 + $0x2] ss:$0 sm:$0xff]  ;;  %v96_v15 = vmul.f32 %v123_v5, %v90_v1  ;;  %s232_s2 = smov [#allocation8]   ;;  %vm104_vm1 = vcmask 1042400  }
  0x39   :  { %v77_v8 = vmul.f32 %v122_v6, %v76_v4  ;;  %s112_s22 = sshll.u32 %s232_s2, 4  ;;  %s113_s22 = int_to_ptr.vmem [resolvable:$true] %s112_s22 }
  0x3a   :  { %56 = vrot.lane.b32.xlu0 %v50_v0, %s230_s20  ;;  %s198_s23 = scalar_lea.vmem %s113_s22, 32  ;;  %p203_p11 = scmp.lt.s32.totalorder %s113_s22, %s113_s22 }
  0x3b   :  { %82 = vrot.lane.b32.xlu1 %v78_v2, %s230_s20  ;;  %v80_v14 = vadd.f32 %v79_v7, %v77_v8  ;;  %p199_p10 = scmp.ne.s32.totalorder %s113_s22, %s198_s23  ;;  %p204_p12 = scmp.lt.s32.totalorder %s198_s23, %s198_s23 }
  0x3d   :  { %p205_p13 = por %p204_p12, %p203_p11 }
  0x3e   :  { %99 = vrot.lane.b32.xlu0 %v89_v3, %s231_s21 }
  0x3f   :  { %p206_p0 = pnand %p205_p13, %p199_p10 }
  0xa8   :  { %v55_v9 = vpop.permute.xlu0 %54 }
  0xa9   :  { %v93_v10 = vpop.permute.xlu1 %92  ;;  %v62_v11 = vmul.f32 %v122_v6, %v55_v9 }
  0xaa   :  { %v95_v19 = vmul.f32 %v122_v6, %v93_v10 }
  0xab   :  { %v68_v18 = vadd.f32 %v67_v12, %v62_v11 }
  0xac   :  { %v57_v16 = vpop.permute.xlu0 %56  ;;  %v97_v25 = vadd.f32 %v96_v15, %v95_v19 }
  0xad   :  { %v83_v17 = vpop.permute.xlu1 %82  ;;  %v73_v20 = vmul.f32 %v124_v13, %v57_v16 }
  0xae   :  { %v85_v21 = vmul.f32 %v124_v13, %v83_v17 }
  0xaf   :  { %v74_v22 = vadd.f32 %v73_v20, %v68_v18 }
  0xb0   :  { %v86_v23 = vadd.f32 %v85_v21, %v80_v14  ;;  %v100_v24 = vpop.permute.xlu0 %99 }
  0xb1   :  { %75 = vst [vmem:[#allocation8] sm:$0x3] %v74_v22  ;;  %v102_v26 = vmul.f32 %v124_v13, %v100_v24 }
  0xb2   :  { %88 = vst.msk [vmem:[#allocation8] sm:$0x3] %vm87_vm0, %v86_v23 }
  0xb3   :  { %v103_v27 = vadd.f32 %v102_v26, %v97_v25 }
  0xb5   :  { %105 = vst.msk [vmem:[#allocation8] sm:$0x3] %vm104_vm1, %v103_v27 }
  0xb6   :  { %209 = shalt.err (!%p206_p0)
}
  0xb7   :  { %s210_s26 = scalar_lea.hbm %s304_s3, 32 }
  0xb8   :  { %p211_p1 = scmp.ne.s32.totalorder %s304_s3, %s210_s26  ;;  %p214_p2 = scmp.lt.u32.totalorder %s210_s26, %s304_s3 }
  0xba   :  { %p216_p3 = pnand %p214_p2, %p211_p1 }
  0xbc   :  { %219 = shalt.err (!%p216_p3)
}
  0xbd   :  { %115 = dma.vmem_to_hbm [thread:$0]  %s113_s22, 32, %s304_s3, [#allocation4]  }
  0xbe   :  { %224 = dma.done.wait [#allocation4], 32  }
  0xbf   :  { %225 = vsyncadd [#allocation4], 4294967264 }
  0xc0   :  { %119 = vsyncpa [#allocation3], 1 }
  0xc1   :  { %120 = vsyncpa [#allocation6], 1 }
  0xc2   :  { %121 = vsyncpa [#allocation4], 1 }

</bundles_post_ra>
